<compile_context>
chip_gen: v6e
topology: v6e:2x2x1
jax: 0.10.0
libtpu: 0.0.40
codegen_flags: <defaults>
</compile_context>

<pallas_src>
import functools
import math

import jax
import jax.numpy as jnp
from jax.experimental import pallas as pl
from jax.experimental.pallas import tpu as pltpu

# --- NF4 emulation (parameter setup, plain JAX glue) -------------------------

_NF4_CODES = jnp.asarray(
    [-1.0, -0.6961928009986877, -0.5250730514526367, -0.39491748809814453,
     -0.28444138169288635, -0.18477343022823334, -0.09105003625154495, 0.0,
     0.07958029955625534, 0.16093020141124725, 0.24611230194568634,
     0.33791524171829224, 0.44070982933044434, 0.5626170039176941,
     0.7229568362236023, 1.0], dtype=jnp.float32)


def nf4_quant_dequant(w, block_size=64):
  """Emulate bnb NF4 blockwise quantization (quantize then dequantize)."""
  # TODO(synk): bnb's compress_statistics=True double-quantizes absmax (8-bit);
  # absmax kept in fp32 here.
  orig_shape, orig_dtype = w.shape, w.dtype
  flat = w.astype(jnp.float32).reshape(-1, block_size)
  absmax = jnp.max(jnp.abs(flat), axis=1, keepdims=True)
  absmax = jnp.where(absmax == 0.0, 1.0, absmax)
  normed = flat / absmax
  idx = jnp.argmin(jnp.abs(normed[..., None] - _NF4_CODES), axis=-1)
  deq = _NF4_CODES[idx] * absmax
  return deq.reshape(orig_shape).astype(orig_dtype)


# --- Fused Pallas kernel ------------------------------------------------------

def _mlp_fused_kernel(x_ref, wgu_ref, wd_ref, o_ref, guacc, oacc, *, tn, tk):
  """out = (silu(x@Wg) * (x@Wu)) @ Wd, fully fused in VMEM.

  Grid: i over M tiles (parallel), j over m tiles (arbitrary, carries oacc),
  k over hd tiles (arbitrary, gate/up reduction). x / out / oacc stay resident
  across (j, k); the hidden activation never touches HBM.
  """
  j = pl.program_id(1)
  k = pl.program_id(2)
  nj = pl.num_programs(1)
  nk = pl.num_programs(2)

  @pl.when((j == 0) & (k == 0))
  def _():
    oacc[...] = jnp.zeros_like(oacc)

  @pl.when(k == 0)
  def _():
    guacc[...] = jnp.zeros_like(guacc)

  # x is resident for the whole M tile; slice the current k chunk in VMEM.
  xk = x_ref[:, pl.ds(pl.multiple_of(k * tk, 128), tk)]
  # Single MXU stream over the interleaved [Wg | Wu] block.
  guacc[...] += jnp.dot(xk, wgu_ref[...], preferred_element_type=jnp.float32)

  @pl.when(k == nk - 1)
  def _():
    gu = guacc[...]
    g = gu[:, :tn]
    u = gu[:, tn:]
    # SiLU with the divide routed to the EUP (cheap even on v5e's f32 VPU).
    h = g * pl.reciprocal(1.0 + jnp.exp(-g), approx=True) * u
    oacc[...] += jnp.dot(h.astype(wd_ref.dtype), wd_ref[...],
                         preferred_element_type=jnp.float32)

  @pl.when((j == nj - 1) & (k == nk - 1))
  def _():
    o_ref[...] = oacc[...].astype(o_ref.dtype)


# --- Tile / VMEM selection helpers -------------------------------------------

def _round_up(x, n):
  return (x + n - 1) // n * n


def _pick_tile(dim, pref, lo=128):
  """Largest power-of-two-ish tile <= pref that divides dim (dim % 128 == 0)."""
  if dim <= pref:
    return dim
  t = pref
  while t >= lo:
    if dim % t == 0:
      return t
    t //= 2
  return lo if dim % lo == 0 else dim


@functools.lru_cache(maxsize=1)
def _vmem_capacity_bytes():
  try:
    info = pltpu.get_tpu_info()
    cap = getattr(info, "vmem_capacity_bytes", None)
    if cap:
      return int(cap)
  except Exception:
    pass
  return 64 * 1024 * 1024  # conservative fallback: v7x per-TC VMEM


def _vmem_estimate(tm, tn, tk, hdp):
  bf = 2  # bf16 bytes
  return (2 * tm * hdp * bf          # resident x (double-buffered)
          + 2 * tk * (2 * tn) * bf   # fused [Wg|Wu] tile
          + 2 * tn * hdp * bf        # Wd tile
          + 2 * tm * hdp * bf        # output tile
          + tm * (2 * tn) * 4        # gate|up f32 accumulator
          + tm * hdp * 4)            # output f32 accumulator


# --- Wrapper ------------------------------------------------------------------

@functools.partial(jax.jit, static_argnames=("tm", "tn", "tk"))
def mlp_forward(x, wg, wu, wd, *, tm=None, tn=None, tk=None):
  """x: (B, S, hd); wg/wu: (hd, m); wd: (m, hd) -> (B, S, hd) in x.dtype."""
  B, S, hd = x.shape
  hd_w, m = wg.shape
  assert hd_w == hd and wu.shape == (hd, m) and wd.shape == (m, hd)

  compute_dtype = jnp.bfloat16          # native MXU input dtype on all gens
  M = B * S
  hd_p = _round_up(hd, 128)
  m_p = _round_up(m, 128)

  cap = _vmem_capacity_bytes()
  budget = (cap * 3) // 4               # ~48 MiB on v7x, ~96 MiB on v5e/v6e
  big_vmem = cap >= 100 * 1024 * 1024   # 128 MiB chips (v5e / v6e)

  tm_pref = tm if tm is not None else 512
  tn_pref = tn if tn is not None else (1024 if big_vmem else 512)
  tk_pref = tk if tk is not None else 512

  tk_eff = _pick_tile(hd_p, tk_pref)
  tn_eff = _pick_tile(m_p, tn_pref)

  # Shrink tiles until the estimate fits the per-generation VMEM budget.
  while _vmem_estimate(tm_pref, tn_eff, tk_eff, hd_p) > budget and tm_pref > 128:
    tm_pref //= 2
  while _vmem_estimate(tm_pref, tn_eff, tk_eff, hd_p) > budget and tn_eff > 128:
    tn_eff = _pick_tile(m_p, max(128, tn_eff // 2))

  # Balanced M tile for ragged token counts (avoid a nearly-empty last tile).
  n_i = max(1, math.ceil(M / tm_pref))
  tm_eff = min(tm_pref, _round_up(math.ceil(M / n_i), 16))
  Mp = _round_up(M, tm_eff)

  x2d = x.reshape(M, hd).astype(compute_dtype)
  x2d = jnp.pad(x2d, ((0, Mp - M), (0, hd_p - hd)))

  wg_p = jnp.pad(wg.astype(compute_dtype), ((0, hd_p - hd), (0, m_p - m)))
  wu_p = jnp.pad(wu.astype(compute_dtype), ((0, hd_p - hd), (0, m_p - m)))
  wd_p = jnp.pad(wd.astype(compute_dtype), ((0, m_p - m), (0, hd_p - hd)))

  nj = m_p // tn_eff
  # Interleave Wg / Wu column blocks at tn granularity: block j of the fused
  # operand is [Wg[:, j*tn:(j+1)*tn] | Wu[:, j*tn:(j+1)*tn]].
  wgu = jnp.concatenate(
      [wg_p.reshape(hd_p, nj, tn_eff), wu_p.reshape(hd_p, nj, tn_eff)],
      axis=2).reshape(hd_p, 2 * m_p)

  grid = (Mp // tm_eff, nj, hd_p // tk_eff)
  est = _vmem_estimate(tm_eff, tn_eff, tk_eff, hd_p)
  vmem_limit = int(min(cap, max(budget, est + (4 << 20))))

  kernel = functools.partial(_mlp_fused_kernel, tn=tn_eff, tk=tk_eff)

  out = pl.pallas_call(
      kernel,
      out_shape=jax.ShapeDtypeStruct((Mp, hd_p), compute_dtype),
      grid_spec=pltpu.PrefetchScalarGridSpec(
          num_scalar_prefetch=0,
          grid=grid,
          in_specs=[
              pl.BlockSpec((tm_eff, hd_p), lambda i, j, k: (i, 0)),        # x (resident per i)
              pl.BlockSpec((tk_eff, 2 * tn_eff), lambda i, j, k: (k, j)),  # [Wg|Wu]
              pl.BlockSpec((tn_eff, hd_p), lambda i, j, k: (j, 0)),        # Wd
          ],
          out_specs=pl.BlockSpec((tm_eff, hd_p), lambda i, j, k: (i, 0)),
          scratch_shapes=[
              pltpu.VMEM((tm_eff, 2 * tn_eff), jnp.float32),  # gate|up acc
              pltpu.VMEM((tm_eff, hd_p), jnp.float32),        # output acc
          ],
      ),
      compiler_params=pltpu.CompilerParams(
          dimension_semantics=("parallel", "arbitrary", "arbitrary"),
          vmem_limit_bytes=vmem_limit),
  )(x2d, wgu, wd_p)

  return out[:M, :hd].astype(x.dtype).reshape(B, S, hd)


# --- Reference (plain JAX, mirrors the kernel's bf16 pipeline) ----------------

def mlp_reference(x, wg, wu, wd):
  xf = x.astype(jnp.bfloat16).astype(jnp.float32)
  wgf = wg.astype(jnp.bfloat16).astype(jnp.float32)
  wuf = wu.astype(jnp.bfloat16).astype(jnp.float32)
  wdf = wd.astype(jnp.bfloat16).astype(jnp.float32)
  g = xf @ wgf
  u = xf @ wuf
  h = (g * jax.nn.sigmoid(g)) * u
  h = h.astype(jnp.bfloat16).astype(jnp.float32)
  return (h @ wdf).astype(x.dtype)


if __name__ == "__main__":
  # Small shapes consistent with the module (hd -> m -> hd SwiGLU MLP).
  B, S = 2, 4
  hd, m = 256, 512
  dtype = jnp.float16

  key = jax.random.PRNGKey(0)
  kx, kg, ku, kd = jax.random.split(key, 4)

  x = (jax.random.normal(kx, (B, S, hd), jnp.float32) * 0.5).astype(dtype)

  # Deterministic weight init ([in, out] layout), passed through the NF4
  # quantize->dequantize emulation like bnb would.
  wg = nf4_quant_dequant(
      (jax.random.normal(kg, (hd, m), jnp.float32) * (hd ** -0.5)).astype(dtype))
  wu = nf4_quant_dequant(
      (jax.random.normal(ku, (hd, m), jnp.float32) * (hd ** -0.5)).astype(dtype))
  wd = nf4_quant_dequant(
      (jax.random.normal(kd, (m, hd), jnp.float32) * (m ** -0.5)).astype(dtype))

  out = jax.block_until_ready(mlp_forward(x, wg, wu, wd))

  ref = mlp_reference(x, wg, wu, wd)
  assert out.shape == (B, S, hd) and out.dtype == dtype
  assert jnp.allclose(out.astype(jnp.float32), ref.astype(jnp.float32),
                      atol=2e-2, rtol=2e-2)

  print("KERNEL_OK")
</pallas_src>

<mosaic_0001>
module attributes {stable_mosaic.version = 11 : i64} {
  func.func @_mlp_fused_kernel(%arg0: i32, %arg1: i32, %arg2: i32, %arg3: memref<16x256xbf16, #tpu.memory_space<vmem>>, %arg4: memref<256x1024xbf16, #tpu.memory_space<vmem>>, %arg5: memref<512x256xbf16, #tpu.memory_space<vmem>>, %arg6: memref<16x256xbf16, #tpu.memory_space<vmem>>, %arg7: memref<16x1024xf32, #tpu.memory_space<vmem>>, %arg8: memref<16x256xf32, #tpu.memory_space<vmem>>) attributes {dimension_semantics = [#tpu.dimension_semantics<parallel>, #tpu.dimension_semantics<arbitrary>, #tpu.dimension_semantics<arbitrary>], iteration_bounds = array<i64: 1, 1, 1>, scalar_prefetch = 0 : i64, scratch_operands = 2 : i64, tpu.core_type = #tpu.core_type<tc>, window_params = [{transform_indices = @transform_0, window_bounds = array<i64: 16, 256>}, {transform_indices = @transform_1, window_bounds = array<i64: 256, 1024>}, {transform_indices = @transform_2, window_bounds = array<i64: 512, 256>}, {transform_indices = @transform_3, window_bounds = array<i64: 16, 256>}]} {
    %c0_i32 = arith.constant 0 : i32
    %0 = arith.cmpi eq, %arg1, %c0_i32 : i32
    %c0_i32_0 = arith.constant 0 : i32
    %1 = arith.cmpi eq, %arg2, %c0_i32_0 : i32
    %2 = arith.andi %0, %1 : i1
    %3 = arith.extui %2 : i1 to i32
    %c0_i32_1 = arith.constant 0 : i32
    %4 = arith.cmpi ne, %3, %c0_i32_1 : i32
    scf.if %4 {
      %cst_15 = arith.constant 0.000000e+00 : f32
      %25 = vector.broadcast %cst_15 : f32 to vector<16x256xf32>
      %c0_16 = arith.constant 0 : index
      %c0_17 = arith.constant 0 : index
      %26 = vector.load %arg8[%c0_16, %c0_17] : memref<16x256xf32, #tpu.memory_space<vmem>>, vector<16x256xf32>
      tpu.vector_store %arg8[%c0_16, %c0_17], %25 {strides = array<i32>} : memref<16x256xf32, #tpu.memory_space<vmem>>, vector<16x256xf32>,
    } else {
    }
    %c0_i32_2 = arith.constant 0 : i32
    %5 = arith.cmpi eq, %arg2, %c0_i32_2 : i32
    %6 = arith.extui %5 : i1 to i32
    %c0_i32_3 = arith.constant 0 : i32
    %7 = arith.cmpi ne, %6, %c0_i32_3 : i32
    scf.if %7 {
      %cst_15 = arith.constant 0.000000e+00 : f32
      %25 = vector.broadcast %cst_15 : f32 to vector<16x1024xf32>
      %c0_16 = arith.constant 0 : index
      %c0_17 = arith.constant 0 : index
      %26 = vector.load %arg7[%c0_16, %c0_17] : memref<16x1024xf32, #tpu.memory_space<vmem>>, vector<16x1024xf32>
      tpu.vector_store %arg7[%c0_16, %c0_17], %25 {strides = array<i32>} : memref<16x1024xf32, #tpu.memory_space<vmem>>, vector<16x1024xf32>,
    } else {
    }
    %c256_i32 = arith.constant 256 : i32
    %8 = arith.muli %arg2, %c256_i32 : i32
    %9 = tpu.assume_multiple %8, 128 : i32
    %c0 = arith.constant 0 : index
    %10 = arith.index_cast %9 : i32 to index
    %11 = vector.load %arg3[%c0, %10] : memref<16x256xbf16, #tpu.memory_space<vmem>>, vector<16x256xbf16>
    %c0_4 = arith.constant 0 : index
    %c0_5 = arith.constant 0 : index
    %12 = vector.load %arg7[%c0_4, %c0_5] : memref<16x1024xf32, #tpu.memory_space<vmem>>, vector<16x1024xf32>
    %c0_6 = arith.constant 0 : index
    %c0_7 = arith.constant 0 : index
    %13 = vector.load %arg4[%c0_6, %c0_7] : memref<256x1024xbf16, #tpu.memory_space<vmem>>, vector<256x1024xbf16>
    %cst = arith.constant dense<0.000000e+00> : vector<16x1024xf32>
    %14 = tpu.matmul %11, %13, %cst {dimension_numbers = #tpu.dot_dimension_numbers<[1], [0], [0], [1], [0, 0, 1, 1], [], []>} : vector<16x256xbf16>, vector<256x1024xbf16>, vector<16x1024xf32> -> vector<16x1024xf32>
    %15 = arith.addf %12, %14 : vector<16x1024xf32>
    %c0_8 = arith.constant 0 : index
    %c0_9 = arith.constant 0 : index
    %16 = vector.load %arg7[%c0_8, %c0_9] : memref<16x1024xf32, #tpu.memory_space<vmem>>, vector<16x1024xf32>
    tpu.vector_store %arg7[%c0_8, %c0_9], %15 {strides = array<i32>} : memref<16x1024xf32, #tpu.memory_space<vmem>>, vector<16x1024xf32>,
    %c0_i32_10 = arith.constant 0 : i32
    %17 = arith.cmpi eq, %arg2, %c0_i32_10 : i32
    %18 = arith.extui %17 : i1 to i32
    %c0_i32_11 = arith.constant 0 : i32
    %19 = arith.cmpi ne, %18, %c0_i32_11 : i32
    scf.if %19 {
      %c0_15 = arith.constant 0 : index
      %c0_16 = arith.constant 0 : index
      %25 = vector.load %arg7[%c0_15, %c0_16] : memref<16x1024xf32, #tpu.memory_space<vmem>>, vector<16x1024xf32>
      %26 = vector.extract_strided_slice %25 {offsets = [0, 0], sizes = [16, 512], strides = [1, 1]} : vector<16x1024xf32> to vector<16x512xf32>
      %27 = vector.extract_strided_slice %25 {offsets = [0, 512], sizes = [16, 512], strides = [1, 1]} : vector<16x1024xf32> to vector<16x512xf32>
      %cst_17 = arith.constant 0.000000e+00 : f32
      %28 = vector.broadcast %cst_17 : f32 to vector<16x512xf32>
      %29 = arith.subf %28, %26 : vector<16x512xf32>
      %30 = math.exp %29 : vector<16x512xf32>
      %cst_18 = arith.constant 1.000000e+00 : f32
      %31 = vector.broadcast %cst_18 : f32 to vector<16x512xf32>
      %32 = arith.addf %31, %30 : vector<16x512xf32>
      %33 = tpu.reciprocal %32 {approx = true} : vector<16x512xf32> -> vector<16x512xf32>
      %34 = arith.mulf %26, %33 : vector<16x512xf32>
      %35 = arith.mulf %34, %27 : vector<16x512xf32>
      %c0_19 = arith.constant 0 : index
      %c0_20 = arith.constant 0 : index
      %36 = vector.load %arg8[%c0_19, %c0_20] : memref<16x256xf32, #tpu.memory_space<vmem>>, vector<16x256xf32>
      %37 = arith.truncf %35 : vector<16x512xf32> to vector<16x512xbf16>
      %c0_21 = arith.constant 0 : index
      %c0_22 = arith.constant 0 : index
      %38 = vector.load %arg5[%c0_21, %c0_22] : memref<512x256xbf16, #tpu.memory_space<vmem>>, vector<512x256xbf16>
      %cst_23 = arith.constant dense<0.000000e+00> : vector<16x256xf32>
      %39 = tpu.matmul %37, %38, %cst_23 {dimension_numbers = #tpu.dot_dimension_numbers<[1], [0], [0], [1], [0, 0, 1, 1], [], []>} : vector<16x512xbf16>, vector<512x256xbf16>, vector<16x256xf32> -> vector<16x256xf32>
      %40 = arith.addf %36, %39 : vector<16x256xf32>
      %c0_24 = arith.constant 0 : index
      %c0_25 = arith.constant 0 : index
      %41 = vector.load %arg8[%c0_24, %c0_25] : memref<16x256xf32, #tpu.memory_space<vmem>>, vector<16x256xf32>
      tpu.vector_store %arg8[%c0_24, %c0_25], %40 {strides = array<i32>} : memref<16x256xf32, #tpu.memory_space<vmem>>, vector<16x256xf32>,
    } else {
    }
    %c0_i32_12 = arith.constant 0 : i32
    %20 = arith.cmpi eq, %arg1, %c0_i32_12 : i32
    %c0_i32_13 = arith.constant 0 : i32
    %21 = arith.cmpi eq, %arg2, %c0_i32_13 : i32
    %22 = arith.andi %20, %21 : i1
    %23 = arith.extui %22 : i1 to i32
    %c0_i32_14 = arith.constant 0 : i32
    %24 = arith.cmpi ne, %23, %c0_i32_14 : i32
    scf.if %24 {
      %c0_15 = arith.constant 0 : index
      %c0_16 = arith.constant 0 : index
      %25 = vector.load %arg8[%c0_15, %c0_16] : memref<16x256xf32, #tpu.memory_space<vmem>>, vector<16x256xf32>
      %26 = arith.truncf %25 : vector<16x256xf32> to vector<16x256xbf16>
      %c0_17 = arith.constant 0 : index
      %c0_18 = arith.constant 0 : index
      %27 = vector.load %arg6[%c0_17, %c0_18] : memref<16x256xbf16, #tpu.memory_space<vmem>>, vector<16x256xbf16>
      tpu.vector_store %arg6[%c0_17, %c0_18], %26 {strides = array<i32>} : memref<16x256xbf16, #tpu.memory_space<vmem>>, vector<16x256xbf16>,
    } else {
    }
    return
  }
  func.func @transform_0(%arg0: i32, %arg1: i32, %arg2: i32) -> (i32, i32) {
    %c0_i32 = arith.constant 0 : i32
    %c0_i32_0 = arith.constant 0 : i32
    return %arg0, %c0_i32 : i32, i32
  }
  func.func @transform_1(%arg0: i32, %arg1: i32, %arg2: i32) -> (i32, i32) {
    %c0_i32 = arith.constant 0 : i32
    return %arg2, %arg1 : i32, i32
  }
  func.func @transform_2(%arg0: i32, %arg1: i32, %arg2: i32) -> (i32, i32) {
    %c0_i32 = arith.constant 0 : i32
    %c0_i32_0 = arith.constant 0 : i32
    return %arg1, %c0_i32 : i32, i32
  }
  func.func @transform_3(%arg0: i32, %arg1: i32, %arg2: i32) -> (i32, i32) {
    %c0_i32 = arith.constant 0 : i32
    %c0_i32_0 = arith.constant 0 : i32
    return %arg0, %c0_i32 : i32, i32
  }
}

</mosaic_0001>

<bundles_post_ra>
// kernel: mlp_forward.1
= control target key start
LH: loop header
LB: loop body
LE: loop exit
PB: predicated region body
PF: predicated region fallthrough
CT: control target
= control target key end

     0   :  { %s2616_s1 = inlined_call_operand.vmem [shape: bf16[256,1024], index: 1, kind: input, shape index: {}]   ;;  %s2617_s0 = inlined_call_operand.vmem [shape: bf16[16,256], index: 0, kind: input, shape index: {}]   ;;  %s2618_s2 = inlined_call_operand.vmem [shape: bf16[512,256], index: 2, kind: input, shape index: {}]   ;;  %s2619_s3 = inlined_call_operand.vmem [shape: bf16[16,256], index: 3, kind: output, shape index: {}]  }
   0x1   :  { %v122_v0 = vld [vmem:[%s2616_s1 + $0x1c0] sm:$0xff]  ;;  %v123_v2 = vld [vmem:[%s2616_s1 + $0x1c8] sm:$0xff] }
   0x2   :  { %v126_v1 = vld [vmem:[%s2616_s1 + $0x1e0] sm:$0xff]  ;;  %v127_v4 = vld [vmem:[%s2616_s1 + $0x1e8] sm:$0xff] }
   0x3   :  { %v1694_v3 = vcombine.high %v122_v0, %v126_v1  ;;  %v1693_v5 = vcombine.low %v122_v0, %v126_v1  ;;  %v114_v6 = vld [vmem:[%s2616_s1 + $0x180] sm:$0xff]  ;;  %v1696_v8 = vcombine.high %v123_v2, %v127_v4  ;;  %v1695_v9 = vcombine.low %v123_v2, %v127_v4  ;;  %v115_v11 = vld [vmem:[%s2616_s1 + $0x188] sm:$0xff] }
   0x4   :  { %v118_v7 = vld [vmem:[%s2616_s1 + $0x1a0] sm:$0xff]  ;;  %v119_v12 = vld [vmem:[%s2616_s1 + $0x1a8] sm:$0xff] }
   0x5   :  { %v1686_v10 = vcombine.high %v114_v6, %v118_v7  ;;  %v106_v13 = vld [vmem:[%s2616_s1 + $0x140] sm:$0xff]  ;;  %844 = vmatprep.subr.bf16.mxu0 %v1694_v3  ;;  %v1688_v14 = vcombine.high %v115_v11, %v119_v12  ;;  %v107_v16 = vld [vmem:[%s2616_s1 + $0x148] sm:$0xff]  ;;  %887 = vmatprep.subr.bf16.mxu1 %v1696_v8  ;;  %v1685_v18 = vcombine.low %v114_v6, %v118_v7 }
   0x6   :  { %v110_v15 = vld [vmem:[%s2616_s1 + $0x160] sm:$0xff]  ;;  %v111_v17 = vld [vmem:[%s2616_s1 + $0x168] sm:$0xff]  ;;  %845 = vmatpush1.bf16.msra.mxu0 %v1693_v5  ;;  %888 = vmatpush1.bf16.msra.mxu1 %v1695_v9  ;;  %v1687_v19 = vcombine.low %v115_v11, %v119_v12 }
   0x7   :  { %846 = vmatprep.subr.bf16.mxu0 %v1686_v10  ;;  %v1678_v20 = vcombine.high %v106_v13, %v110_v15  ;;  %889 = vmatprep.subr.bf16.mxu1 %v1688_v14  ;;  %v1680_v21 = vcombine.high %v107_v16, %v111_v17  ;;  %v98_v22 = vld [vmem:[%s2616_s1 + $0x100] sm:$0xff]  ;;  %v99_v24 = vld [vmem:[%s2616_s1 + $0x108] sm:$0xff]  ;;  %v1677_v26 = vcombine.low %v106_v13, %v110_v15 }
   0x8   :  { %v102_v23 = vld [vmem:[%s2616_s1 + $0x120] sm:$0xff]  ;;  %v103_v25 = vld [vmem:[%s2616_s1 + $0x128] sm:$0xff]  ;;  %v1679_v27 = vcombine.low %v107_v16, %v111_v17 }
   0x9   :  { %v1670_v28 = vcombine.high %v98_v22, %v102_v23  ;;  %v1672_v29 = vcombine.high %v99_v24, %v103_v25  ;;  %v90_v30 = vld [vmem:[%s2616_s1 + $0xc0] sm:$0xff]  ;;  %v91_v32 = vld [vmem:[%s2616_s1 + $0xc8] sm:$0xff]  ;;  %v1669_v34 = vcombine.low %v98_v22, %v102_v23  ;;  %v1671_v35 = vcombine.low %v99_v24, %v103_v25 }
   0xa   :  { %847 = vmatpush1.bf16.msra.mxu0 %v1685_v18  ;;  %890 = vmatpush1.bf16.msra.mxu1 %v1687_v19  ;;  %v94_v31 = vld [vmem:[%s2616_s1 + $0xe0] sm:$0xff]  ;;  %v95_v33 = vld [vmem:[%s2616_s1 + $0xe8] sm:$0xff] }
   0xb   :  { %848 = vmatprep.subr.bf16.mxu0 %v1678_v20  ;;  %891 = vmatprep.subr.bf16.mxu1 %v1680_v21  ;;  %v1662_v36 = vcombine.high %v90_v30, %v94_v31  ;;  %v1664_v37 = vcombine.high %v91_v32, %v95_v33  ;;  %v82_v38 = vld [vmem:[%s2616_s1 + $0x80] sm:$0xff]  ;;  %v83_v40 = vld [vmem:[%s2616_s1 + $0x88] sm:$0xff]  ;;  %v1661_v42 = vcombine.low %v90_v30, %v94_v31 }
   0xc   :  { %v86_v39 = vld [vmem:[%s2616_s1 + $0xa0] sm:$0xff]  ;;  %v87_v41 = vld [vmem:[%s2616_s1 + $0xa8] sm:$0xff]  ;;  %v1663_v43 = vcombine.low %v91_v32, %v95_v33 }
   0xd   :  { %v1654_v44 = vcombine.high %v82_v38, %v86_v39  ;;  %v1656_v45 = vcombine.high %v83_v40, %v87_v41  ;;  %v74_v46 = vld [vmem:[%s2616_s1 + $0x40] sm:$0xff]  ;;  %v75_v48 = vld [vmem:[%s2616_s1 + $0x48] sm:$0xff]  ;;  %v1653_v50 = vcombine.low %v82_v38, %v86_v39  ;;  %v1655_v51 = vcombine.low %v83_v40, %v87_v41 }
   0xe   :  { %849 = vmatpush1.bf16.msra.mxu0 %v1677_v26  ;;  %892 = vmatpush1.bf16.msra.mxu1 %v1679_v27  ;;  %v78_v47 = vld [vmem:[%s2616_s1 + $0x60] sm:$0xff]  ;;  %v79_v49 = vld [vmem:[%s2616_s1 + $0x68] sm:$0xff] }
   0xf   :  { %850 = vmatprep.subr.bf16.mxu0 %v1670_v28  ;;  %893 = vmatprep.subr.bf16.mxu1 %v1672_v29  ;;  %v1646_v52 = vcombine.high %v74_v46, %v78_v47  ;;  %v1648_v53 = vcombine.high %v75_v48, %v79_v49  ;;  %v66_v54 = vld [vmem:[%s2616_s1] sm:$0xff]  ;;  %v67_v57 = vld [vmem:[%s2616_s1 + $0x8] sm:$0xff]  ;;  %v1645_v59 = vcombine.low %v74_v46, %v78_v47 }
  0x10   :  { %v70_v55 = vld [vmem:[%s2616_s1 + $0x20] sm:$0xff]  ;;  %v71_v58 = vld [vmem:[%s2616_s1 + $0x28] sm:$0xff]  ;;  %v1647_v60 = vcombine.low %v75_v48, %v79_v49 }
  0x11   :  { %v2077_v56 = vld [vmem:[%s2617_s0 + $0x4] ss:$8 sps:$4 sm:$0xff]   ;;  %v1638_v61 = vcombine.high %v66_v54, %v70_v55  ;;  %v1640_v62 = vcombine.high %v67_v57, %v71_v58  ;;  %v1637_v3 = vcombine.low %v66_v54, %v70_v55  ;;  %v1639_v4 = vcombine.low %v67_v57, %v71_v58 }
  0x12   :  { %851 = vmatpush1.bf16.msra.mxu0 %v1669_v34  ;;  %894 = vmatpush1.bf16.msra.mxu1 %v1671_v35  ;;  %v186_v63 = vld [vmem:[%s2616_s1 + $0x3c0] sm:$0xff]  ;;  %v187_v1 = vld [vmem:[%s2616_s1 + $0x3c8] sm:$0xff] }
  0x13   :  { %852 = vmatprep.subr.bf16.mxu0 %v1662_v36  ;;  %895 = vmatprep.subr.bf16.mxu1 %v1664_v37  ;;  %v190_v0 = vld [vmem:[%s2616_s1 + $0x3e0] sm:$0xff]  ;;  %v191_v2 = vld [vmem:[%s2616_s1 + $0x3e8] sm:$0xff] }
  0x14   :  { %876 = vmatprep.mubr.bf16.mxu0 %v2077_v56  ;;  %919 = vmatprep.mubr.bf16.mxu1 %v2077_v56  ;;  %v1758_v5 = vcombine.high %v186_v63, %v190_v0  ;;  %v1760_v6 = vcombine.high %v187_v1, %v191_v2  ;;  %v178_v7 = vld [vmem:[%s2616_s1 + $0x380] sm:$0xff]  ;;  %v179_v9 = vld [vmem:[%s2616_s1 + $0x388] sm:$0xff]  ;;  %v1757_v11 = vcombine.low %v186_v63, %v190_v0  ;;  %v124_v0 = vld [vmem:[%s2616_s1 + $0x1d0] sm:$0xff] }
  0x15   :  { %v182_v8 = vld [vmem:[%s2616_s1 + $0x3a0] sm:$0xff]  ;;  %v183_v10 = vld [vmem:[%s2616_s1 + $0x3a8] sm:$0xff]  ;;  %v1759_v12 = vcombine.low %v187_v1, %v191_v2  ;;  %v128_v1 = vld [vmem:[%s2616_s1 + $0x1f0] sm:$0xff] }
  0x16   :  { %853 = vmatpush1.bf16.msra.mxu0 %v1661_v42  ;;  %896 = vmatpush1.bf16.msra.mxu1 %v1663_v43  ;;  %v1750_v13 = vcombine.high %v178_v7, %v182_v8  ;;  %v1752_v14 = vcombine.high %v179_v9, %v183_v10  ;;  %v170_v15 = vld [vmem:[%s2616_s1 + $0x340] sm:$0xff]  ;;  %v171_v17 = vld [vmem:[%s2616_s1 + $0x348] sm:$0xff]  ;;  %v1749_v19 = vcombine.low %v178_v7, %v182_v8  ;;  %v125_v2 = vld [vmem:[%s2616_s1 + $0x1d8] sm:$0xff] }
  0x17   :  { %854 = vmatprep.subr.bf16.mxu0 %v1654_v44  ;;  %897 = vmatprep.subr.bf16.mxu1 %v1656_v45  ;;  %v174_v16 = vld [vmem:[%s2616_s1 + $0x360] sm:$0xff]  ;;  %v175_v18 = vld [vmem:[%s2616_s1 + $0x368] sm:$0xff]  ;;  %v1751_v20 = vcombine.low %v179_v9, %v183_v10  ;;  %v116_v8 = vld [vmem:[%s2616_s1 + $0x190] sm:$0xff] }
  0x18   :  { %v1742_v21 = vcombine.high %v170_v15, %v174_v16  ;;  %v1744_v22 = vcombine.high %v171_v17, %v175_v18  ;;  %v162_v23 = vld [vmem:[%s2616_s1 + $0x300] sm:$0xff]  ;;  %v163_v25 = vld [vmem:[%s2616_s1 + $0x308] sm:$0xff]  ;;  %v1741_v27 = vcombine.low %v170_v15, %v174_v16  ;;  %v1743_v28 = vcombine.low %v171_v17, %v175_v18  ;;  %v120_v9 = vld [vmem:[%s2616_s1 + $0x1b0] sm:$0xff] }
  0x19   :  { %v166_v24 = vld [vmem:[%s2616_s1 + $0x320] sm:$0xff]  ;;  %v167_v26 = vld [vmem:[%s2616_s1 + $0x328] sm:$0xff]  ;;  %v1690_v15 = vcombine.high %v116_v8, %v120_v9  ;;  %v108_v17 = vld [vmem:[%s2616_s1 + $0x150] sm:$0xff] }
  0x1a   :  { %855 = vmatpush1.bf16.msra.mxu0 %v1653_v50  ;;  %898 = vmatpush1.bf16.msra.mxu1 %v1655_v51  ;;  %v1734_v29 = vcombine.high %v162_v23, %v166_v24  ;;  %v1736_v30 = vcombine.high %v163_v25, %v167_v26  ;;  %v154_v31 = vld [vmem:[%s2616_s1 + $0x2c0] sm:$0xff]  ;;  %v155_v33 = vld [vmem:[%s2616_s1 + $0x2c8] sm:$0xff]  ;;  %v1733_v35 = vcombine.low %v162_v23, %v166_v24  ;;  %v112_v18 = vld [vmem:[%s2616_s1 + $0x170] sm:$0xff] }
  0x1b   :  { %856 = vmatprep.subr.bf16.mxu0 %v1646_v52  ;;  %899 = vmatprep.subr.bf16.mxu1 %v1648_v53  ;;  %v158_v32 = vld [vmem:[%s2616_s1 + $0x2e0] sm:$0xff]  ;;  %v159_v34 = vld [vmem:[%s2616_s1 + $0x2e8] sm:$0xff]  ;;  %v1735_v36 = vcombine.low %v163_v25, %v167_v26  ;;  %v1682_v23 = vcombine.high %v108_v17, %v112_v18  ;;  %v100_v25 = vld [vmem:[%s2616_s1 + $0x110] sm:$0xff] }
  0x1c   :  { %v1726_v37 = vcombine.high %v154_v31, %v158_v32  ;;  %v1728_v38 = vcombine.high %v155_v33, %v159_v34  ;;  %v146_v39 = vld [vmem:[%s2616_s1 + $0x280] sm:$0xff]  ;;  %v147_v41 = vld [vmem:[%s2616_s1 + $0x288] sm:$0xff]  ;;  %v1725_v43 = vcombine.low %v154_v31, %v158_v32  ;;  %v1727_v44 = vcombine.low %v155_v33, %v159_v34  ;;  %v104_v26 = vld [vmem:[%s2616_s1 + $0x130] sm:$0xff] }
  0x1d   :  { %v150_v40 = vld [vmem:[%s2616_s1 + $0x2a0] sm:$0xff]  ;;  %v151_v42 = vld [vmem:[%s2616_s1 + $0x2a8] sm:$0xff]  ;;  %v1674_v31 = vcombine.high %v100_v25, %v104_v26  ;;  %v92_v33 = vld [vmem:[%s2616_s1 + $0xd0] sm:$0xff] }
  0x1e   :  { %857 = vmatpush1.bf16.msra.mxu0 %v1645_v59  ;;  %900 = vmatpush1.bf16.msra.mxu1 %v1647_v60  ;;  %v1718_v45 = vcombine.high %v146_v39, %v150_v40  ;;  %v1720_v46 = vcombine.high %v147_v41, %v151_v42  ;;  %v138_v47 = vld [vmem:[%s2616_s1 + $0x240] sm:$0xff]  ;;  %v139_v49 = vld [vmem:[%s2616_s1 + $0x248] sm:$0xff]  ;;  %v1717_v51 = vcombine.low %v146_v39, %v150_v40  ;;  %v96_v34 = vld [vmem:[%s2616_s1 + $0xf0] sm:$0xff] }
  0x1f   :  { %858 = vmatprep.subr.bf16.mxu0 %v1638_v61  ;;  %901 = vmatprep.subr.bf16.mxu1 %v1640_v62  ;;  %v142_v48 = vld [vmem:[%s2616_s1 + $0x260] sm:$0xff]  ;;  %v143_v50 = vld [vmem:[%s2616_s1 + $0x268] sm:$0xff]  ;;  %v1719_v52 = vcombine.low %v147_v41, %v151_v42  ;;  %v84_v40 = vld [vmem:[%s2616_s1 + $0x90] sm:$0xff] }
  0x20   :  { %v1710_v53 = vcombine.high %v138_v47, %v142_v48  ;;  %v1712_v54 = vcombine.high %v139_v49, %v143_v50  ;;  %v130_v55 = vld [vmem:[%s2616_s1 + $0x200] sm:$0xff]  ;;  %v131_v58 = vld [vmem:[%s2616_s1 + $0x208] sm:$0xff]  ;;  %v1709_v60 = vcombine.low %v138_v47, %v142_v48  ;;  %v1711_v61 = vcombine.low %v139_v49, %v143_v50  ;;  %v88_v41 = vld [vmem:[%s2616_s1 + $0xb0] sm:$0xff] }
  0x21   :  { %v134_v57 = vld [vmem:[%s2616_s1 + $0x220] sm:$0xff]  ;;  %v135_v59 = vld [vmem:[%s2616_s1 + $0x228] sm:$0xff]  ;;  %v85_v42 = vld [vmem:[%s2616_s1 + $0x98] sm:$0xff] }
  0x22   :  { %859 = vmatpush1.bf16.msra.mxu0 %v1637_v3  ;;  %902 = vmatpush1.bf16.msra.mxu1 %v1639_v4  ;;  %v1702_v62 = vcombine.high %v130_v55, %v134_v57  ;;  %v1704_v63 = vcombine.high %v131_v58, %v135_v59  ;;  %v129_v3 = vld [vmem:[%s2616_s1 + $0x1f8] sm:$0xff]  ;;  %v1701_v4 = vcombine.low %v130_v55, %v134_v57  ;;  %v2204_v10 = vld [vmem:[%s2617_s0] ss:$8 sps:$4 sm:$0xff]   ;;  %v76_v48 = vld [vmem:[%s2616_s1 + $0x50] sm:$0xff] }
  0x23   :  { %860 = vmatprep.subr.bf16.mxu0 %v1758_v5  ;;  %903 = vmatprep.subr.bf16.mxu1 %v1760_v6  ;;  %v1703_v5 = vcombine.low %v131_v58, %v135_v59  ;;  %v1698_v6 = vcombine.high %v124_v0, %v128_v1  ;;  %v1700_v7 = vcombine.high %v125_v2, %v129_v3  ;;  %v80_v49 = vld [vmem:[%s2616_s1 + $0x70] sm:$0xff]  ;;  %v77_v50 = vld [vmem:[%s2616_s1 + $0x58] sm:$0xff] }
  0x24   :  { %v68_v57 = vld [vmem:[%s2616_s1 + $0x10] sm:$0xff]  ;;  %v69_v59 = vld [vmem:[%s2616_s1 + $0x18] sm:$0xff] }
  0x25   :  { %v72_v58 = vld [vmem:[%s2616_s1 + $0x30] sm:$0xff] }
  0x26   :  { %861 = vmatpush2.bf16.msra.mxu0 %v1757_v11  ;;  %904 = vmatpush2.bf16.msra.mxu1 %v1759_v12  ;;  %v117_v11 = vld [vmem:[%s2616_s1 + $0x198] sm:$0xff] }
  0x27   :  { %862 = vmatprep.subr.bf16.mxu0 %v1750_v13  ;;  %905 = vmatprep.subr.bf16.mxu1 %v1752_v14  ;;  %v121_v12 = vld [vmem:[%s2616_s1 + $0x1b8] sm:$0xff]  ;;  %v1697_v13 = vcombine.low %v124_v0, %v128_v1  ;;  %v1699_v14 = vcombine.low %v125_v2, %v129_v3  ;;  %v188_v1 = vld [vmem:[%s2616_s1 + $0x3d0] sm:$0xff] }
  0x28   :  { %v1692_v16 = vcombine.high %v117_v11, %v121_v12  ;;  %v192_v2 = vld [vmem:[%s2616_s1 + $0x3f0] sm:$0xff]  ;;  %v189_v3 = vld [vmem:[%s2616_s1 + $0x3d8] sm:$0xff] }
  0x2a   :  { %863 = vmatpush2.bf16.msra.mxu0 %v1749_v19  ;;  %906 = vmatpush2.bf16.msra.mxu1 %v1751_v20  ;;  %v109_v19 = vld [vmem:[%s2616_s1 + $0x158] sm:$0xff] }
  0x2b   :  { %864 = vmatprep.subr.bf16.mxu0 %v1742_v21  ;;  %907 = vmatprep.subr.bf16.mxu1 %v1744_v22  ;;  %v113_v20 = vld [vmem:[%s2616_s1 + $0x178] sm:$0xff]  ;;  %v1689_v21 = vcombine.low %v116_v8, %v120_v9  ;;  %v1691_v22 = vcombine.low %v117_v11, %v121_v12  ;;  %v180_v9 = vld [vmem:[%s2616_s1 + $0x390] sm:$0xff] }
  0x2c   :  { %v1684_v24 = vcombine.high %v109_v19, %v113_v20  ;;  %v184_v11 = vld [vmem:[%s2616_s1 + $0x3b0] sm:$0xff]  ;;  %v181_v12 = vld [vmem:[%s2616_s1 + $0x398] sm:$0xff] }
  0x2e   :  { %865 = vmatpush2.bf16.msra.mxu0 %v1741_v27  ;;  %908 = vmatpush2.bf16.msra.mxu1 %v1743_v28  ;;  %v101_v27 = vld [vmem:[%s2616_s1 + $0x118] sm:$0xff] }
  0x2f   :  { %866 = vmatprep.subr.bf16.mxu0 %v1734_v29  ;;  %909 = vmatprep.subr.bf16.mxu1 %v1736_v30  ;;  %v105_v28 = vld [vmem:[%s2616_s1 + $0x138] sm:$0xff]  ;;  %v1681_v29 = vcombine.low %v108_v17, %v112_v18  ;;  %v1683_v30 = vcombine.low %v109_v19, %v113_v20  ;;  %v172_v18 = vld [vmem:[%s2616_s1 + $0x350] sm:$0xff] }
  0x30   :  { %v1676_v32 = vcombine.high %v101_v27, %v105_v28  ;;  %v176_v19 = vld [vmem:[%s2616_s1 + $0x370] sm:$0xff]  ;;  %v173_v20 = vld [vmem:[%s2616_s1 + $0x358] sm:$0xff] }
  0x32   :  { %867 = vmatpush2.bf16.msra.mxu0 %v1733_v35  ;;  %910 = vmatpush2.bf16.msra.mxu1 %v1735_v36  ;;  %v97_v35 = vld [vmem:[%s2616_s1 + $0xf8] sm:$0xff]  ;;  %v1673_v36 = vcombine.low %v100_v25, %v104_v26  ;;  %v164_v26 = vld [vmem:[%s2616_s1 + $0x310] sm:$0xff] }
  0x33   :  { %868 = vmatprep.subr.bf16.mxu0 %v1726_v37  ;;  %911 = vmatprep.subr.bf16.mxu1 %v1728_v38  ;;  %v1675_v37 = vcombine.low %v101_v27, %v105_v28  ;;  %v1666_v38 = vcombine.high %v92_v33, %v96_v34  ;;  %v168_v27 = vld [vmem:[%s2616_s1 + $0x330] sm:$0xff]  ;;  %v165_v28 = vld [vmem:[%s2616_s1 + $0x318] sm:$0xff] }
  0x36   :  { %869 = vmatpush2.bf16.msra.mxu0 %v1725_v43  ;;  %912 = vmatpush2.bf16.msra.mxu1 %v1727_v44  ;;  %v89_v43 = vld [vmem:[%s2616_s1 + $0xb8] sm:$0xff]  ;;  %v1665_v44 = vcombine.low %v92_v33, %v96_v34  ;;  %v156_v34 = vld [vmem:[%s2616_s1 + $0x2d0] sm:$0xff] }
  0x37   :  { %870 = vmatprep.subr.bf16.mxu0 %v1718_v45  ;;  %913 = vmatprep.subr.bf16.mxu1 %v1720_v46  ;;  %v1658_v46 = vcombine.high %v84_v40, %v88_v41  ;;  %v1660_v47 = vcombine.high %v85_v42, %v89_v43 }
  0x3a   :  { %871 = vmatpush2.bf16.msra.mxu0 %v1717_v51  ;;  %914 = vmatpush2.bf16.msra.mxu1 %v1719_v52  ;;  %v81_v51 = vld [vmem:[%s2616_s1 + $0x78] sm:$0xff]  ;;  %v1657_v52 = vcombine.low %v84_v40, %v88_v41  ;;  %v148_v41 = vld [vmem:[%s2616_s1 + $0x290] sm:$0xff] }
  0x3b   :  { %872 = vmatprep.subr.bf16.mxu0 %v1710_v53  ;;  %915 = vmatprep.subr.bf16.mxu1 %v1712_v54  ;;  %v1659_v53 = vcombine.low %v85_v42, %v89_v43  ;;  %v1650_v54 = vcombine.high %v76_v48, %v80_v49  ;;  %v1652_v55 = vcombine.high %v77_v50, %v81_v51  ;;  %v152_v42 = vld [vmem:[%s2616_s1 + $0x2b0] sm:$0xff]  ;;  %v149_v43 = vld [vmem:[%s2616_s1 + $0x298] sm:$0xff] }
  0x3e   :  { %873 = vmatpush2.bf16.msra.mxu0 %v1709_v60  ;;  %916 = vmatpush2.bf16.msra.mxu1 %v1711_v61  ;;  %v73_v60 = vld [vmem:[%s2616_s1 + $0x38] sm:$0xff]  ;;  %v1649_v61 = vcombine.low %v76_v48, %v80_v49  ;;  %v140_v49 = vld [vmem:[%s2616_s1 + $0x250] sm:$0xff] }
  0x3f   :  { %874 = vmatprep.subr.bf16.mxu0 %v1702_v62  ;;  %917 = vmatprep.subr.bf16.mxu1 %v1704_v63  ;;  %v1651_v62 = vcombine.low %v77_v50, %v81_v51  ;;  %v1642_v63 = vcombine.high %v68_v57, %v72_v58  ;;  %v1644_v0 = vcombine.high %v69_v59, %v73_v60  ;;  %v144_v50 = vld [vmem:[%s2616_s1 + $0x270] sm:$0xff]  ;;  %v141_v51 = vld [vmem:[%s2616_s1 + $0x258] sm:$0xff] }
  0x42   :  { %875 = vmatpush2.bf16.msra.mxu0 %v1701_v4  ;;  %918 = vmatpush2.bf16.msra.mxu1 %v1703_v5  ;;  %v193_v4 = vld [vmem:[%s2616_s1 + $0x3f8] sm:$0xff]  ;;  %v1641_v5 = vcombine.low %v68_v57, %v72_v58  ;;  %v132_v58 = vld [vmem:[%s2616_s1 + $0x210] sm:$0xff] }
  0x43   :  { %930 = vmatprep.subr.bf16.mxu0 %v1698_v6  ;;  %973 = vmatprep.subr.bf16.mxu1 %v1700_v7  ;;  %v1643_v6 = vcombine.low %v69_v59, %v73_v60  ;;  %v1762_v7 = vcombine.high %v188_v1, %v192_v2  ;;  %v1764_v8 = vcombine.high %v189_v3, %v193_v4  ;;  %v136_v59 = vld [vmem:[%s2616_s1 + $0x230] sm:$0xff]  ;;  %v133_v60 = vld [vmem:[%s2616_s1 + $0x218] sm:$0xff] }
  0x45   :  { %877 = vmatmul.mubr.bf16.vlgmr.msra.gmra.mxu0 %v2204_v10  ;;  %920 = vmatmul.mubr.bf16.vlgmr.msra.gmra.mxu1 %v2204_v10 }
  0x46   :  { %931 = vmatpush1.bf16.msra.mxu0 %v1697_v13  ;;  %974 = vmatpush1.bf16.msra.mxu1 %v1699_v14  ;;  %v185_v13 = vld [vmem:[%s2616_s1 + $0x3b8] sm:$0xff]  ;;  %v1761_v14 = vcombine.low %v188_v1, %v192_v2  ;;  %v1705_v2 = vcombine.low %v132_v58, %v136_v59 }
  0x47   :  { %932 = vmatprep.subr.bf16.mxu0 %v1690_v15  ;;  %975 = vmatprep.subr.bf16.mxu1 %v1692_v16  ;;  %v1763_v15 = vcombine.low %v189_v3, %v193_v4  ;;  %v1754_v16 = vcombine.high %v180_v9, %v184_v11  ;;  %v1756_v17 = vcombine.high %v181_v12, %v185_v13  ;;  %v1838_v4 = vld [vmem:[%s2618_s2 + $0x74] ss:$8 sps:$4 sm:$0xff]  }
  0x48   :  { %962 = vmatprep.mubr.bf16.mxu0 %v2077_v56  ;;  %1005 = vmatprep.mubr.bf16.mxu1 %v2077_v56  ;;  %v93_v56 = vld [vmem:[%s2616_s1 + $0xd8] sm:$0xff] }
  0x49   :  { %v1668_v39 = vcombine.high %v93_v56, %v97_v35  ;;  %v1667_v45 = vcombine.low %v93_v56, %v97_v35  ;;  %v160_v56 = vld [vmem:[%s2616_s1 + $0x2f0] sm:$0xff]  ;;  %v157_v35 = vld [vmem:[%s2616_s1 + $0x2d8] sm:$0xff] }
  0x4a   :  { %933 = vmatpush1.bf16.msra.mxu0 %v1689_v21  ;;  %976 = vmatpush1.bf16.msra.mxu1 %v1691_v22  ;;  %v177_v21 = vld [vmem:[%s2616_s1 + $0x378] sm:$0xff]  ;;  %v1753_v22 = vcombine.low %v180_v9, %v184_v11  ;;  %v1842_v9 = vld [vmem:[%s2618_s2 + $0x60] ss:$8 sps:$4 sm:$0xff]  }
  0x4b   :  { %934 = vmatprep.subr.bf16.mxu0 %v1682_v23  ;;  %977 = vmatprep.subr.bf16.mxu1 %v1684_v24  ;;  %v1755_v23 = vcombine.low %v181_v12, %v185_v13  ;;  %v1746_v24 = vcombine.high %v172_v18, %v176_v19  ;;  %v1748_v25 = vcombine.high %v173_v20, %v177_v21  ;;  %v1845_v11 = vld [vmem:[%s2618_s2 + $0x160] ss:$8 sps:$4 sm:$0xff]   ;;  %v1850_v12 = vld [vmem:[%s2618_s2 + $0x54] ss:$8 sps:$4 sm:$0xff]  }
  0x4c   :  { %v1853_v13 = vld [vmem:[%s2618_s2 + $0x154] ss:$8 sps:$4 sm:$0xff]  }
  0x4e   :  { %935 = vmatpush1.bf16.msra.mxu0 %v1681_v29  ;;  %978 = vmatpush1.bf16.msra.mxu1 %v1683_v30  ;;  %v169_v29 = vld [vmem:[%s2616_s1 + $0x338] sm:$0xff]  ;;  %v1745_v30 = vcombine.low %v172_v18, %v176_v19  ;;  %v1854_v18 = vld [vmem:[%s2618_s2 + $0x40] ss:$8 sps:$4 sm:$0xff]  }
  0x4f   :  { %936 = vmatprep.subr.bf16.mxu0 %v1674_v31  ;;  %979 = vmatprep.subr.bf16.mxu1 %v1676_v32  ;;  %v1747_v31 = vcombine.low %v173_v20, %v177_v21  ;;  %v1738_v32 = vcombine.high %v164_v26, %v168_v27  ;;  %v1740_v33 = vcombine.high %v165_v28, %v169_v29  ;;  %v1857_v19 = vld [vmem:[%s2618_s2 + $0x140] ss:$8 sps:$4 sm:$0xff]   ;;  %v1862_v20 = vld [vmem:[%s2618_s2 + $0x34] ss:$8 sps:$4 sm:$0xff]  }
  0x50   :  { %v1865_v21 = vld [vmem:[%s2618_s2 + $0x134] ss:$8 sps:$4 sm:$0xff]  }
  0x52   :  { %937 = vmatpush1.bf16.msra.mxu0 %v1673_v36  ;;  %980 = vmatpush1.bf16.msra.mxu1 %v1675_v37  ;;  %v161_v36 = vld [vmem:[%s2616_s1 + $0x2f8] sm:$0xff]  ;;  %v1737_v37 = vcombine.low %v164_v26, %v168_v27  ;;  %v1866_v26 = vld [vmem:[%s2618_s2 + $0x20] ss:$8 sps:$4 sm:$0xff]  }
  0x53   :  { %938 = vmatprep.subr.bf16.mxu0 %v1666_v38  ;;  %981 = vmatprep.subr.bf16.mxu1 %v1668_v39  ;;  %v1739_v38 = vcombine.low %v165_v28, %v169_v29  ;;  %v1730_v39 = vcombine.high %v156_v34, %v160_v56  ;;  %v1732_v40 = vcombine.high %v157_v35, %v161_v36  ;;  %v1869_v27 = vld [vmem:[%s2618_s2 + $0x120] ss:$8 sps:$4 sm:$0xff]   ;;  %v1874_v28 = vld [vmem:[%s2618_s2 + $0x14] ss:$8 sps:$4 sm:$0xff]  }
  0x54   :  { %v1877_v29 = vld [vmem:[%s2618_s2 + $0x114] ss:$8 sps:$4 sm:$0xff]  }
  0x56   :  { %939 = vmatpush1.bf16.msra.mxu0 %v1665_v44  ;;  %982 = vmatpush1.bf16.msra.mxu1 %v1667_v45  ;;  %v153_v44 = vld [vmem:[%s2616_s1 + $0x2b8] sm:$0xff]  ;;  %v1729_v45 = vcombine.low %v156_v34, %v160_v56  ;;  %v1878_v34 = vld [vmem:[%s2618_s2] ss:$8 sps:$4 sm:$0xff]  }
  0x57   :  { %940 = vmatprep.subr.bf16.mxu0 %v1658_v46  ;;  %983 = vmatprep.subr.bf16.mxu1 %v1660_v47  ;;  %v1731_v46 = vcombine.low %v157_v35, %v161_v36  ;;  %v1722_v47 = vcombine.high %v148_v41, %v152_v42  ;;  %v1724_v48 = vcombine.high %v149_v43, %v153_v44  ;;  %v1881_v56 = vld [vmem:[%s2618_s2 + $0x100] ss:$8 sps:$4 sm:$0xff]   ;;  %v1884_v35 = vld [vmem:[%s2618_s2 + $0xf0] ss:$8 sps:$4 sm:$0xff]   ;;  %v1886_v36 = vld [vmem:[%s2618_s2 + $0xf4] ss:$8 sps:$4 sm:$0xff]  }
  0x5a   :  { %941 = vmatpush1.bf16.msra.mxu0 %v1657_v52  ;;  %984 = vmatpush1.bf16.msra.mxu1 %v1659_v53  ;;  %v145_v52 = vld [vmem:[%s2616_s1 + $0x278] sm:$0xff]  ;;  %v1721_v53 = vcombine.low %v148_v41, %v152_v42  ;;  %v1890_v41 = vld [vmem:[%s2618_s2 + $0xe0] ss:$8 sps:$4 sm:$0xff]  }
  0x5b   :  { %942 = vmatprep.subr.bf16.mxu0 %v1650_v54  ;;  %985 = vmatprep.subr.bf16.mxu1 %v1652_v55  ;;  %v1723_v54 = vcombine.low %v149_v43, %v153_v44  ;;  %v1714_v55 = vcombine.high %v140_v49, %v144_v50  ;;  %v1716_v57 = vcombine.high %v141_v51, %v145_v52  ;;  %v1898_v42 = vld [vmem:[%s2618_s2 + $0xd4] ss:$8 sps:$4 sm:$0xff]   ;;  %v1893_v43 = vld [vmem:[%s2618_s2 + $0x1e0] ss:$8 sps:$4 sm:$0xff]  }
  0x5c   :  { %v1901_v44 = vld [vmem:[%s2618_s2 + $0x1d4] ss:$8 sps:$4 sm:$0xff]  }
  0x5e   :  { %943 = vmatpush1.bf16.msra.mxu0 %v1649_v61  ;;  %986 = vmatpush1.bf16.msra.mxu1 %v1651_v62  ;;  %v137_v61 = vld [vmem:[%s2616_s1 + $0x238] sm:$0xff]  ;;  %v1713_v62 = vcombine.low %v140_v49, %v144_v50  ;;  %v1902_v49 = vld [vmem:[%s2618_s2 + $0xc0] ss:$8 sps:$4 sm:$0xff]  }
  0x5f   :  { %944 = vmatprep.subr.bf16.mxu0 %v1642_v63  ;;  %987 = vmatprep.subr.bf16.mxu1 %v1644_v0  ;;  %v1715_v63 = vcombine.low %v141_v51, %v145_v52  ;;  %v1706_v0 = vcombine.high %v132_v58, %v136_v59  ;;  %v1708_v1 = vcombine.high %v133_v60, %v137_v61  ;;  %v1910_v50 = vld [vmem:[%s2618_s2 + $0xb4] ss:$8 sps:$4 sm:$0xff]   ;;  %v1905_v51 = vld [vmem:[%s2618_s2 + $0x1c0] ss:$8 sps:$4 sm:$0xff]  }
  0x60   :  { %v1707_v3 = vcombine.low %v133_v60, %v137_v61  ;;  %v1913_v52 = vld [vmem:[%s2618_s2 + $0x1b4] ss:$8 sps:$4 sm:$0xff]   ;;  %v1914_v58 = vld [vmem:[%s2618_s2 + $0xa0] ss:$8 sps:$4 sm:$0xff]  }
  0x61   :  { %v1917_v59 = vld [vmem:[%s2618_s2 + $0x1a0] ss:$8 sps:$4 sm:$0xff]   ;;  %v1922_v60 = vld [vmem:[%s2618_s2 + $0x94] ss:$8 sps:$4 sm:$0xff]  }
  0x62   :  { %945 = vmatpush1.bf16.msra.mxu0 %v1641_v5  ;;  %988 = vmatpush1.bf16.msra.mxu1 %v1643_v6  ;;  %v1836_v5 = vld [vmem:[%s2618_s2 + $0x70] ss:$8 sps:$4 sm:$0xff]   ;;  %v1925_v61 = vld [vmem:[%s2618_s2 + $0x194] ss:$8 sps:$4 sm:$0xff]  }
  0x63   :  { %946 = vmatprep.subr.bf16.mxu0 %v1762_v7  ;;  %989 = vmatprep.subr.bf16.mxu1 %v1764_v8  ;;  %v1839_v6 = vld [vmem:[%s2618_s2 + $0x170] ss:$8 sps:$4 sm:$0xff]   ;;  %v1841_v7 = vld [vmem:[%s2618_s2 + $0x174] ss:$8 sps:$4 sm:$0xff]   ;;  %v1847_v8 = vld [vmem:[%s2618_s2 + $0x164] ss:$8 sps:$4 sm:$0xff]  }
  0x66   :  { %947 = vmatpush2.bf16.msra.mxu0 %v1761_v14  ;;  %990 = vmatpush2.bf16.msra.mxu1 %v1763_v15  ;;  %v1848_v14 = vld [vmem:[%s2618_s2 + $0x50] ss:$8 sps:$4 sm:$0xff]  }
  0x67   :  { %948 = vmatprep.subr.bf16.mxu0 %v1754_v16  ;;  %991 = vmatprep.subr.bf16.mxu1 %v1756_v17  ;;  %v1851_v15 = vld [vmem:[%s2618_s2 + $0x150] ss:$8 sps:$4 sm:$0xff]   ;;  %v1856_v16 = vld [vmem:[%s2618_s2 + $0x44] ss:$8 sps:$4 sm:$0xff]  }
  0x68   :  { %v1859_v17 = vld [vmem:[%s2618_s2 + $0x144] ss:$8 sps:$4 sm:$0xff]  }
  0x6a   :  { %949 = vmatpush2.bf16.msra.mxu0 %v1753_v22  ;;  %992 = vmatpush2.bf16.msra.mxu1 %v1755_v23  ;;  %v1860_v22 = vld [vmem:[%s2618_s2 + $0x30] ss:$8 sps:$4 sm:$0xff]  }
  0x6b   :  { %950 = vmatprep.subr.bf16.mxu0 %v1746_v24  ;;  %993 = vmatprep.subr.bf16.mxu1 %v1748_v25  ;;  %v1863_v23 = vld [vmem:[%s2618_s2 + $0x130] ss:$8 sps:$4 sm:$0xff]   ;;  %v1868_v24 = vld [vmem:[%s2618_s2 + $0x24] ss:$8 sps:$4 sm:$0xff]  }
  0x6c   :  { %v1871_v25 = vld [vmem:[%s2618_s2 + $0x124] ss:$8 sps:$4 sm:$0xff]  }
  0x6e   :  { %951 = vmatpush2.bf16.msra.mxu0 %v1745_v30  ;;  %994 = vmatpush2.bf16.msra.mxu1 %v1747_v31  ;;  %v1872_v30 = vld [vmem:[%s2618_s2 + $0x10] ss:$8 sps:$4 sm:$0xff]  }
  0x6f   :  { %952 = vmatprep.subr.bf16.mxu0 %v1738_v32  ;;  %995 = vmatprep.subr.bf16.mxu1 %v1740_v33  ;;  %v1875_v31 = vld [vmem:[%s2618_s2 + $0x110] ss:$8 sps:$4 sm:$0xff]   ;;  %v1880_v32 = vld [vmem:[%s2618_s2 + $0x4] ss:$8 sps:$4 sm:$0xff]  }
  0x70   :  { %v1883_v33 = vld [vmem:[%s2618_s2 + $0x104] ss:$8 sps:$4 sm:$0xff]  }
  0x72   :  { %953 = vmatpush2.bf16.msra.mxu0 %v1737_v37  ;;  %996 = vmatpush2.bf16.msra.mxu1 %v1739_v38  ;;  %v1889_v37 = vld [vmem:[%s2618_s2 + $0x1f4] ss:$8 sps:$4 sm:$0xff]   ;;  %v1892_v38 = vld [vmem:[%s2618_s2 + $0xe4] ss:$8 sps:$4 sm:$0xff]  }
  0x73   :  { %954 = vmatprep.subr.bf16.mxu0 %v1730_v39  ;;  %997 = vmatprep.subr.bf16.mxu1 %v1732_v40  ;;  %v1887_v39 = vld [vmem:[%s2618_s2 + $0x1f0] ss:$8 sps:$4 sm:$0xff]   ;;  %v1895_v40 = vld [vmem:[%s2618_s2 + $0x1e4] ss:$8 sps:$4 sm:$0xff]  }
  0x76   :  { %955 = vmatpush2.bf16.msra.mxu0 %v1729_v45  ;;  %998 = vmatpush2.bf16.msra.mxu1 %v1731_v46  ;;  %v1896_v45 = vld [vmem:[%s2618_s2 + $0xd0] ss:$8 sps:$4 sm:$0xff]   ;;  %v1904_v46 = vld [vmem:[%s2618_s2 + $0xc4] ss:$8 sps:$4 sm:$0xff]  }
  0x77   :  { %956 = vmatprep.subr.bf16.mxu0 %v1722_v47  ;;  %999 = vmatprep.subr.bf16.mxu1 %v1724_v48  ;;  %v1899_v47 = vld [vmem:[%s2618_s2 + $0x1d0] ss:$8 sps:$4 sm:$0xff]   ;;  %v1907_v48 = vld [vmem:[%s2618_s2 + $0x1c4] ss:$8 sps:$4 sm:$0xff]  }
  0x7a   :  { %957 = vmatpush2.bf16.msra.mxu0 %v1721_v53  ;;  %1000 = vmatpush2.bf16.msra.mxu1 %v1723_v54  ;;  %v1908_v53 = vld [vmem:[%s2618_s2 + $0xb0] ss:$8 sps:$4 sm:$0xff]  }
  0x7b   :  { %958 = vmatprep.subr.bf16.mxu0 %v1714_v55  ;;  %1001 = vmatprep.subr.bf16.mxu1 %v1716_v57  ;;  %v1911_v54 = vld [vmem:[%s2618_s2 + $0x1b0] ss:$8 sps:$4 sm:$0xff]   ;;  %v1916_v55 = vld [vmem:[%s2618_s2 + $0xa4] ss:$8 sps:$4 sm:$0xff]  }
  0x7c   :  { %v1919_v57 = vld [vmem:[%s2618_s2 + $0x1a4] ss:$8 sps:$4 sm:$0xff]  }
  0x7e   :  { %959 = vmatpush2.bf16.msra.mxu0 %v1713_v62  ;;  %1002 = vmatpush2.bf16.msra.mxu1 %v1715_v63  ;;  %v1920_v62 = vld [vmem:[%s2618_s2 + $0x90] ss:$8 sps:$4 sm:$0xff]  }
  0x7f   :  { %960 = vmatprep.subr.bf16.mxu0 %v1706_v0  ;;  %1003 = vmatprep.subr.bf16.mxu1 %v1708_v1  ;;  %v1923_v63 = vld [vmem:[%s2618_s2 + $0x190] ss:$8 sps:$4 sm:$0xff]   ;;  %v1928_v0 = vld [vmem:[%s2618_s2 + $0x84] ss:$8 sps:$4 sm:$0xff]  }
  0x80   :  { %v1931_v1 = vld [vmem:[%s2618_s2 + $0x184] ss:$8 sps:$4 sm:$0xff]  }
  0x82   :  { %961 = vmatpush2.bf16.msra.mxu0 %v1705_v2  ;;  %1004 = vmatpush2.bf16.msra.mxu1 %v1707_v3  ;;  %v1926_v2 = vld [vmem:[%s2618_s2 + $0x80] ss:$8 sps:$4 sm:$0xff]  }
  0x83   :  { %1515 = vmatprep.subr.bf16.mxu0 %v1838_v4  ;;  %1558 = vmatprep.subr.bf16.mxu1 %v1841_v7  ;;  %v1929_v3 = vld [vmem:[%s2618_s2 + $0x180] ss:$8 sps:$4 sm:$0xff]  }
  0x85   :  { %963 = vmatmul.mubr.bf16.vlgmr.msra.gmra.mxu0 %v2204_v10  ;;  %1006 = vmatmul.mubr.bf16.vlgmr.msra.gmra.mxu1 %v2204_v10  ;;  %v1844_v10 = vld [vmem:[%s2618_s2 + $0x64] ss:$8 sps:$4 sm:$0xff]  }
  0x86   :  { %1516 = vmatpush1.bf16.msra.mxu0 %v1836_v5  ;;  %1559 = vmatpush1.bf16.msra.mxu1 %v1839_v6 }
  0x87   :  { %1517 = vmatprep.subr.bf16.mxu0 %v1844_v10  ;;  %1560 = vmatprep.subr.bf16.mxu1 %v1847_v8 }
  0x8a   :  { %1518 = vmatpush1.bf16.msra.mxu0 %v1842_v9  ;;  %1561 = vmatpush1.bf16.msra.mxu1 %v1845_v11 }
  0x8b   :  { %1519 = vmatprep.subr.bf16.mxu0 %v1850_v12  ;;  %1562 = vmatprep.subr.bf16.mxu1 %v1853_v13 }
  0x8e   :  { %1520 = vmatpush1.bf16.msra.mxu0 %v1848_v14  ;;  %1563 = vmatpush1.bf16.msra.mxu1 %v1851_v15 }
  0x8f   :  { %1521 = vmatprep.subr.bf16.mxu0 %v1856_v16  ;;  %1564 = vmatprep.subr.bf16.mxu1 %v1859_v17 }
  0x92   :  { %1522 = vmatpush1.bf16.msra.mxu0 %v1854_v18  ;;  %1565 = vmatpush1.bf16.msra.mxu1 %v1857_v19 }
  0x93   :  { %1523 = vmatprep.subr.bf16.mxu0 %v1862_v20  ;;  %1566 = vmatprep.subr.bf16.mxu1 %v1865_v21 }
  0x96   :  { %1524 = vmatpush1.bf16.msra.mxu0 %v1860_v22  ;;  %1567 = vmatpush1.bf16.msra.mxu1 %v1863_v23 }
  0x97   :  { %1525 = vmatprep.subr.bf16.mxu0 %v1868_v24  ;;  %1568 = vmatprep.subr.bf16.mxu1 %v1871_v25 }
  0x9a   :  { %1526 = vmatpush1.bf16.msra.mxu0 %v1866_v26  ;;  %1569 = vmatpush1.bf16.msra.mxu1 %v1869_v27 }
  0x9b   :  { %1527 = vmatprep.subr.bf16.mxu0 %v1874_v28  ;;  %1570 = vmatprep.subr.bf16.mxu1 %v1877_v29 }
  0x9e   :  { %1528 = vmatpush1.bf16.msra.mxu0 %v1872_v30  ;;  %1571 = vmatpush1.bf16.msra.mxu1 %v1875_v31 }
  0x9f   :  { %1529 = vmatprep.subr.bf16.mxu0 %v1880_v32  ;;  %1572 = vmatprep.subr.bf16.mxu1 %v1883_v33 }
  0xa2   :  { %1530 = vmatpush1.bf16.msra.mxu0 %v1878_v34  ;;  %1573 = vmatpush1.bf16.msra.mxu1 %v1881_v56 }
  0xa3   :  { %1531 = vmatprep.subr.bf16.mxu0 %v1886_v36  ;;  %1574 = vmatprep.subr.bf16.mxu1 %v1889_v37 }
  0xa6   :  { %1532 = vmatpush2.bf16.msra.mxu0 %v1884_v35  ;;  %1575 = vmatpush2.bf16.msra.mxu1 %v1887_v39 }
  0xa7   :  { %1533 = vmatprep.subr.bf16.mxu0 %v1892_v38  ;;  %1576 = vmatprep.subr.bf16.mxu1 %v1895_v40 }
  0xaa   :  { %1534 = vmatpush2.bf16.msra.mxu0 %v1890_v41  ;;  %1577 = vmatpush2.bf16.msra.mxu1 %v1893_v43 }
  0xab   :  { %1535 = vmatprep.subr.bf16.mxu0 %v1898_v42  ;;  %1578 = vmatprep.subr.bf16.mxu1 %v1901_v44 }
  0xae   :  { %1536 = vmatpush2.bf16.msra.mxu0 %v1896_v45  ;;  %1579 = vmatpush2.bf16.msra.mxu1 %v1899_v47 }
  0xaf   :  { %1537 = vmatprep.subr.bf16.mxu0 %v1904_v46  ;;  %1580 = vmatprep.subr.bf16.mxu1 %v1907_v48 }
  0xb2   :  { %1538 = vmatpush2.bf16.msra.mxu0 %v1902_v49  ;;  %1581 = vmatpush2.bf16.msra.mxu1 %v1905_v51 }
  0xb3   :  { %1539 = vmatprep.subr.bf16.mxu0 %v1910_v50  ;;  %1582 = vmatprep.subr.bf16.mxu1 %v1913_v52 }
  0xb6   :  { %1540 = vmatpush2.bf16.msra.mxu0 %v1908_v53  ;;  %1583 = vmatpush2.bf16.msra.mxu1 %v1911_v54 }
  0xb7   :  { %1541 = vmatprep.subr.bf16.mxu0 %v1916_v55  ;;  %1584 = vmatprep.subr.bf16.mxu1 %v1919_v57 }
  0xba   :  { %1542 = vmatpush2.bf16.msra.mxu0 %v1914_v58  ;;  %1585 = vmatpush2.bf16.msra.mxu1 %v1917_v59 }
  0xbb   :  { %1543 = vmatprep.subr.bf16.mxu0 %v1922_v60  ;;  %1586 = vmatprep.subr.bf16.mxu1 %v1925_v61 }
  0xbe   :  { %1544 = vmatpush2.bf16.msra.mxu0 %v1920_v62  ;;  %1587 = vmatpush2.bf16.msra.mxu1 %v1923_v63 }
  0xbf   :  { %1545 = vmatprep.subr.bf16.mxu0 %v1928_v0  ;;  %1588 = vmatprep.subr.bf16.mxu1 %v1931_v1 }
  0xc2   :  { %1546 = vmatpush2.bf16.msra.mxu0 %v1926_v2  ;;  %1589 = vmatpush2.bf16.msra.mxu1 %v1929_v3 }
 0x105   :  { %v2578_v4 = vpop.f32.mrf.mxu0  ;;  %v2580_v5 = vpop.f32.mrf.mxu1 }
 0x106   :  { %v1067_v9 = vsub.f32 0.0, %v2578_v4  ;;  %v1069_v22 = vsub.f32 0.0, %v2580_v5 }
 0x107   :  { %v2582_v6 = vpop.f32.mrf.mxu0  ;;  %v2584_v7 = vpop.f32.mrf.mxu1 }
 0x108   :  { %v1068_v11 = vsub.f32 0.0, %v2582_v6  ;;  %v1070_v12 = vsub.f32 0.0, %v2584_v7  ;;  %v1075_v16 = vmul.f32 1.442695, %v1067_v9  ;;  %v1079_v27 = vmul.f32 1.442695, %v1069_v22 }
 0x109   :  { %v2586_v10 = vpop.f32.mrf.mxu0  ;;  %v2588_v8 = vpop.f32.mrf.mxu1 }
 0x10a   :  { %v1071_v14 = vsub.f32 0.0, %v2586_v10  ;;  %v1073_v17 = vsub.f32 0.0, %v2588_v8  ;;  %v1077_v18 = vmul.f32 1.442695, %v1068_v11  ;;  %v1081_v20 = vmul.f32 1.442695, %v1070_v12 }
 0x10b   :  { %v2593_v13 = vpop.f32.mrf.mxu0  ;;  %v2596_v15 = vpop.f32.mrf.mxu1  ;;  %1932 = vpow2.f32 %v1075_v16 }
 0x10c   :  { %v1072_v19 = vsub.f32 0.0, %v2593_v13  ;;  %v1074_v21 = vsub.f32 0.0, %v2596_v15  ;;  %v1083_v23 = vmul.f32 1.442695, %v1071_v14  ;;  %v1087_v24 = vmul.f32 1.442695, %v1073_v17 }
 0x10d   :  { %1934 = vpow2.f32 %v1077_v18 }
 0x10e   :  { %v1085_v25 = vmul.f32 1.442695, %v1072_v19  ;;  %1936 = vpow2.f32 %v1081_v20  ;;  %v1089_v26 = vmul.f32 1.442695, %v1074_v21 }
 0x10f   :  { %1938 = vpow2.f32 %v1083_v23 }
 0x110   :  { %1940 = vpow2.f32 %v1087_v24 }
 0x111   :  { %1942 = vpow2.f32 %v1085_v25 }
 0x112   :  { %1944 = vpow2.f32 %v1089_v26 }
 0x113   :  { %1946 = vpow2.f32 %v1079_v27 }
 0x118   :  { %v1933_v28 = vpop.eup %1932 }
 0x119   :  { %v1091_v32 = vadd.f32 1.0, %v1933_v28 }
 0x11a   :  { %v1935_v29 = vpop.eup %1934 }
 0x11b   :  { %v1937_v30 = vpop.eup %1936  ;;  %v1092_v34 = vadd.f32 1.0, %v1935_v29  ;;  %1948 = vrcp.f32 %v1091_v32 }
 0x11c   :  { %v1939_v31 = vpop.eup %1938  ;;  %v1094_v35 = vadd.f32 1.0, %v1937_v30 }
 0x11d   :  { %v1941_v33 = vpop.eup %1940  ;;  %v1095_v37 = vadd.f32 1.0, %v1939_v31  ;;  %1950 = vrcp.f32 %v1092_v34 }
 0x11e   :  { %v1943_v56 = vpop.eup %1942  ;;  %v1097_v39 = vadd.f32 1.0, %v1941_v33  ;;  %1952 = vrcp.f32 %v1094_v35 }
 0x11f   :  { %v1945_v36 = vpop.eup %1944  ;;  %v1096_v40 = vadd.f32 1.0, %v1943_v56  ;;  %1954 = vrcp.f32 %v1095_v37 }
 0x120   :  { %v1947_v38 = vpop.eup %1946  ;;  %v1098_v41 = vadd.f32 1.0, %v1945_v36  ;;  %1956 = vrcp.f32 %v1097_v39 }
 0x121   :  { %v1093_v42 = vadd.f32 1.0, %v1947_v38  ;;  %1958 = vrcp.f32 %v1096_v40 }
 0x122   :  { %1960 = vrcp.f32 %v1098_v41 }
 0x123   :  { %1962 = vrcp.f32 %v1093_v42 }
 0x128   :  { %v1949_v43 = vpop.eup %1948 }
 0x129   :  { %v1107_v62 = vmul.f32 %v1949_v43, %v2578_v4 }
 0x12a   :  { %v1951_v44 = vpop.eup %1950 }
 0x12b   :  { %v1953_v45 = vpop.eup %1952  ;;  %v1108_v58 = vmul.f32 %v1951_v44, %v2582_v6 }
 0x12c   :  { %v1955_v46 = vpop.eup %1954  ;;  %v1110_v63 = vmul.f32 %v1953_v45, %v2584_v7 }
 0x12d   :  { %v1957_v48 = vpop.eup %1956  ;;  %v1111_v55 = vmul.f32 %v1955_v46, %v2586_v10 }
 0x12e   :  { %v1959_v50 = vpop.eup %1958  ;;  %v1113_v59 = vmul.f32 %v1957_v48, %v2588_v8 }
 0x12f   :  { %v1961_v52 = vpop.eup %1960  ;;  %v1112_v60 = vmul.f32 %v1959_v50, %v2593_v13 }
 0x130   :  { %v1963_v54 = vpop.eup %1962  ;;  %v1114_v0 = vmul.f32 %v1961_v52, %v2596_v15 }
 0x131   :  { %v1109_v3 = vmul.f32 %v1963_v54, %v2580_v5 }
 0x145   :  { %v964_v47 = vpop.f32.mrf.mxu0  ;;  %v1007_v49 = vpop.f32.mrf.mxu1 }
 0x146   :  { %v1115_v6 = vmul.f32 %v1107_v62, %v964_v47  ;;  %v1117_v16 = vmul.f32 %v1109_v3, %v1007_v49 }
 0x147   :  { %v966_v51 = vpop.f32.mrf.mxu0  ;;  %v1009_v53 = vpop.f32.mrf.mxu1 }
 0x148   :  { %v1116_v9 = vmul.f32 %v1108_v58, %v966_v51  ;;  %v1118_v14 = vmul.f32 %v1110_v63, %v1009_v53 }
 0x149   :  { %v968_v57 = vpop.f32.mrf.mxu0  ;;  %v1011_v61 = vpop.f32.mrf.mxu1 }
 0x14a   :  { %v1119_v1 = vmul.f32 %v1111_v55, %v968_v57  ;;  %v1121_v10 = vmul.f32 %v1113_v59, %v1011_v61 }
 0x14b   :  { %v970_v2 = vpop.f32.mrf.mxu0  ;;  %v1013_v12 = vpop.f32.mrf.mxu1 }
 0x14c   :  { %v1120_v11 = vmul.f32 %v1112_v60, %v970_v2  ;;  %v1122_v8 = vmul.f32 %v1114_v0, %v1013_v12  ;;  %v1127_v17 = vpack.c.bf16 %v1119_v1, %v1115_v6  ;;  %v1129_v4 = vpack.c.bf16 %v1121_v10, %v1117_v16 }
 0x14e   :  { %v1128_v13 = vpack.c.bf16 %v1120_v11, %v1116_v9  ;;  %v1130_v18 = vpack.c.bf16 %v1122_v8, %v1118_v14 }
 0x150   :  { %1547 = vmatprep.mubr.bf16.mxu0 %v1128_v13  ;;  %1590 = vmatprep.mubr.bf16.mxu1 %v1130_v18 }
 0x151   :  { %1548 = vmatmul.mubr.bf16.vlgmr.msra.gmra.mxu0 %v1127_v17  ;;  %1591 = vmatmul.mubr.bf16.vlgmr.msra.gmra.mxu1 %v1129_v4 }
 0x211   :  { %v1549_v7 = vpop.f32.mrf.mxu0  ;;  %v1592_v15 = vpop.f32.mrf.mxu1 }
 0x212   :  { %v1593_v20 = vadd.f32 %v1592_v15, %v1549_v7 }
 0x213   :  { %v1551_v19 = vpop.f32.mrf.mxu0  ;;  %v1594_v5 = vpop.f32.mrf.mxu1 }
 0x214   :  { %v1595_v21 = vadd.f32 %v1594_v5, %v1551_v19 }
 0x215   :  { %v1553_v22 = vpop.f32.mrf.mxu0  ;;  %v1596_v23 = vpop.f32.mrf.mxu1 }
 0x216   :  { %v1831_v24 = vpack.c.bf16 %v1595_v21, %v1593_v20  ;;  %v1597_v27 = vadd.f32 %v1596_v23, %v1553_v22 }
 0x217   :  { %v1555_v25 = vpop.f32.mrf.mxu0  ;;  %v1598_v26 = vpop.f32.mrf.mxu1 }
 0x218   :  { %1627 = vst [vmem:[%s2619_s3] sm:$0xff] %v1831_v24  ;;  %v1599_v28 = vadd.f32 %v1598_v26, %v1555_v25 }
 0x21a   :  { %v1832_v29 = vpack.c.bf16 %v1599_v28, %v1597_v27 }
 0x21c   :  { %1628 = vst [vmem:[%s2619_s3 + $0x8] sm:$0xff] %v1832_v29 }

</bundles_post_ra>
